<compile_context>
chip_gen: v5e
topology: v5e:2x2
jax: 0.10.0
libtpu: 0.0.40
codegen_flags: <defaults>
</compile_context>

<pallas_src>
import functools

import jax
import jax.numpy as jnp
from jax import lax
from jax.experimental import pallas as pl
from jax.experimental.pallas import tpu as pltpu

BN_EPS = 1e-5  # nn.BatchNorm2d default


def _round_up(x, m):
    return (x + m - 1) // m * m


# ----------------------------------------------------------------------------
# Pass 1: tiled matmul (the convolution) + per-tile BN partial statistics.
# ----------------------------------------------------------------------------
def conv_stats_kernel(p_ref, w_ref, conv_ref, stats_ref, acc_ref):
    k = pl.program_id(1)

    @pl.when(k == 0)
    def _():
        acc_ref[...] = jnp.zeros_like(acc_ref)

    # bf16 x bf16 -> f32 accumulation on the MXU.
    acc_ref[...] += jnp.dot(p_ref[...], w_ref[...],
                            preferred_element_type=jnp.float32)

    @pl.when(k == pl.num_programs(1) - 1)
    def _():
        conv = acc_ref[...]                                   # (TM, Cpad) f32
        conv_ref[...] = conv.astype(conv_ref.dtype)
        # Per-tile partial sums for *global* BN statistics (padded rows are
        # all-zero so they contribute nothing; the wrapper divides by true M).
        s = jnp.sum(conv, axis=0, keepdims=True)              # (1, Cpad)
        ss = jnp.sum(conv * conv, axis=0, keepdims=True)      # (1, Cpad)
        rows = lax.broadcasted_iota(jnp.int32, stats_ref.shape, 0)
        stats_ref[...] = jnp.where(rows == 0, s,
                                   jnp.where(rows == 1, ss, 0.0))


# ----------------------------------------------------------------------------
# Pass 2: apply the (already folded) BN affine, lane-dense, tiled over M.
# ----------------------------------------------------------------------------
def bn_apply_kernel(conv_ref, scale_ref, shift_ref, out_ref):
    out_ref[...] = (conv_ref[...] * scale_ref[...]
                    + shift_ref[...]).astype(out_ref.dtype)


# ----------------------------------------------------------------------------
# im2col (wrapper-side gather/reshape).
# TODO(synk): fold the k*k kernel offsets into the Pallas grid (shifted-window
# index_map on an NHWC copy of x) to avoid materializing the k^2-duplicated
# im2col matrix in HBM.
# ----------------------------------------------------------------------------
def im2col(x, kernel_size, stride, padding, dilation):
    """x: [N, Cin, H, W] -> patches [N*Ho*Wo, Cin*k*k], plus (N, Ho, Wo)."""
    N, C, H, W = x.shape
    k = kernel_size
    if padding > 0:
        x = jnp.pad(x, ((0, 0), (0, 0), (padding, padding), (padding, padding)))
    Ho = (H + 2 * padding - dilation * (k - 1) - 1) // stride + 1
    Wo = (W + 2 * padding - dilation * (k - 1) - 1) // stride + 1
    cols = []
    for dy in range(k):
        for dx in range(k):
            sl = x[:, :,
                   dy * dilation: dy * dilation + stride * (Ho - 1) + 1: stride,
                   dx * dilation: dx * dilation + stride * (Wo - 1) + 1: stride]
            cols.append(jnp.transpose(sl, (0, 2, 3, 1)))  # [N, Ho, Wo, C]
    # Flatten (C, kh, kw) in the same order as the PyTorch weight reshape.
    patches = jnp.stack(cols, axis=-1).reshape(N * Ho * Wo, C * k * k)
    return patches, (N, Ho, Wo)


@functools.partial(jax.jit, static_argnames=("stride", "padding", "dilation",
                                             "tile_m", "tile_k"))
def conv2d_bn(x, weight, gamma, beta, *, stride=1, padding=0, dilation=1,
              tile_m=128, tile_k=128):
    """x: [N, Cin, H, W] NCHW, weight: [Cout, Cin, k, k] OIHW (groups=1).

    Returns [N, Cout, Ho, Wo] — Conv2d_BN.forward in training mode
    (BatchNorm2d uses the current batch's statistics).
    """
    Cout, Cin, k, _ = weight.shape
    patches, (N, Ho, Wo) = im2col(x, k, stride, padding, dilation)
    M, K = patches.shape

    M_pad = _round_up(M, tile_m)
    K_pad = _round_up(K, tile_k)
    C_pad = _round_up(Cout, 128)           # lane-dense output / MXU N dim
    m_tiles = M_pad // tile_m
    k_tiles = K_pad // tile_k

    # bf16 MXU operands, zero-padded (padding is numerically inert).
    patches_p = jnp.zeros((M_pad, K_pad), jnp.bfloat16)
    patches_p = patches_p.at[:M, :K].set(patches.astype(jnp.bfloat16))
    w2 = weight.reshape(Cout, Cin * k * k).T.astype(jnp.bfloat16)   # [K, Cout]
    w_p = jnp.zeros((K_pad, C_pad), jnp.bfloat16).at[:K, :Cout].set(w2)

    flops = 2 * M_pad * K_pad * C_pad
    bytes_accessed = (patches_p.size * 2 + w_p.size * 2
                      + M_pad * C_pad * 4 + m_tiles * 8 * C_pad * 4)

    conv_out, stats = pl.pallas_call(
        conv_stats_kernel,
        out_shape=(jax.ShapeDtypeStruct((M_pad, C_pad), jnp.float32),
                   jax.ShapeDtypeStruct((m_tiles * 8, C_pad), jnp.float32)),
        grid=(m_tiles, k_tiles),
        in_specs=[
            pl.BlockSpec((tile_m, tile_k), lambda m, kk: (m, kk)),
            pl.BlockSpec((tile_k, C_pad), lambda m, kk: (kk, 0)),
        ],
        out_specs=(
            pl.BlockSpec((tile_m, C_pad), lambda m, kk: (m, 0)),
            pl.BlockSpec((8, C_pad), lambda m, kk: (m, 0)),
        ),
        scratch_shapes=[pltpu.VMEM((tile_m, C_pad), jnp.float32)],
        compiler_params=pltpu.CompilerParams(
            dimension_semantics=("parallel", "arbitrary"),
            vmem_limit_bytes=32 * 1024 * 1024),
        cost_estimate=pl.CostEstimate(flops=flops, transcendentals=0,
                                      bytes_accessed=bytes_accessed),
    )(patches_p, w_p)

    # Global BN statistics from per-tile partials (tiny O(Cout) epilogue).
    stats = stats.reshape(m_tiles, 8, C_pad)
    total_sum = jnp.sum(stats[:, 0, :Cout], axis=0)
    total_sumsq = jnp.sum(stats[:, 1, :Cout], axis=0)
    mean = total_sum / M
    var = total_sumsq / M - mean * mean          # biased (training-mode) var
    inv_std = lax.rsqrt(var + BN_EPS)
    scale = gamma.astype(jnp.float32) * inv_std
    shift = beta.astype(jnp.float32) - mean * scale
    # Pad folded affine with zeros so padded channels stay exactly 0.
    scale_p = jnp.zeros((1, C_pad), jnp.float32).at[0, :Cout].set(scale)
    shift_p = jnp.zeros((1, C_pad), jnp.float32).at[0, :Cout].set(shift)

    out_flat = pl.pallas_call(
        bn_apply_kernel,
        out_shape=jax.ShapeDtypeStruct((M_pad, C_pad), jnp.float32),
        grid=(m_tiles,),
        in_specs=[
            pl.BlockSpec((tile_m, C_pad), lambda m: (m, 0)),
            pl.BlockSpec((1, C_pad), lambda m: (0, 0)),   # resident across M
            pl.BlockSpec((1, C_pad), lambda m: (0, 0)),
        ],
        out_specs=pl.BlockSpec((tile_m, C_pad), lambda m: (m, 0)),
        compiler_params=pltpu.CompilerParams(
            dimension_semantics=("parallel",),
            vmem_limit_bytes=32 * 1024 * 1024),
    )(conv_out, scale_p, shift_p)

    # [M_pad, C_pad] -> [M, Cout] -> [N, Ho, Wo, Cout] -> NCHW
    out = out_flat[:M, :Cout].reshape(N, Ho, Wo, Cout)
    return jnp.transpose(out, (0, 3, 1, 2))


# ----------------------------------------------------------------------------
# Reference (matches the kernel's bf16 MXU operands; BN in f32).
# ----------------------------------------------------------------------------
def reference_conv2d_bn(x, weight, gamma, beta, *, stride=1, padding=0,
                        dilation=1):
    xb = x.astype(jnp.bfloat16).astype(jnp.float32)
    wb = weight.astype(jnp.bfloat16).astype(jnp.float32)
    conv = lax.conv_general_dilated(
        xb, wb,
        window_strides=(stride, stride),
        padding=((padding, padding), (padding, padding)),
        rhs_dilation=(dilation, dilation),
        dimension_numbers=("NCHW", "OIHW", "NCHW"))
    mean = jnp.mean(conv, axis=(0, 2, 3), keepdims=True)
    var = jnp.mean((conv - mean) ** 2, axis=(0, 2, 3), keepdims=True)
    g = gamma.reshape(1, -1, 1, 1)
    b = beta.reshape(1, -1, 1, 1)
    return g * (conv - mean) * lax.rsqrt(var + BN_EPS) + b


if __name__ == "__main__":
    key = jax.random.PRNGKey(0)
    k_x, k_w = jax.random.split(key)

    # Conv2d_BN(in_features=4, out_features=8, kernel_size=3, stride=1, padding=0)
    N, Cin, H, W = 2, 4, 16, 16
    Cout, ksz, stride, padding, dilation = 8, 3, 1, 0, 1

    x = jax.random.normal(k_x, (N, Cin, H, W), dtype=jnp.float32)
    weight = jax.random.normal(k_w, (Cout, Cin, ksz, ksz),
                               dtype=jnp.float32) * 0.1
    gamma = jnp.ones((Cout,), dtype=jnp.float32)    # bn_weight_init=1
    beta = jnp.zeros((Cout,), dtype=jnp.float32)    # bn.bias init 0
    # TODO(synk): BN running-stats (running_mean/var) buffer updates are
    # training-only bookkeeping, not part of the returned tensor; not reproduced.

    out = conv2d_bn(x, weight, gamma, beta,
                    stride=stride, padding=padding, dilation=dilation)
    out = jax.block_until_ready(out)

    ref = reference_conv2d_bn(x, weight, gamma, beta,
                              stride=stride, padding=padding,
                              dilation=dilation)
    assert out.shape == (N, Cout, H - ksz + 1, W - ksz + 1), out.shape
    max_err = float(jnp.max(jnp.abs(out - ref)))
    assert jnp.allclose(out, ref, rtol=1e-3, atol=1e-3), max_err

    print("KERNEL_OK")
</pallas_src>

<mosaic_0001>
module attributes {stable_mosaic.version = 11 : i64} {
  func.func @conv_stats_kernel(%arg0: i32, %arg1: i32, %arg2: memref<128x128xbf16, #tpu.memory_space<vmem>>, %arg3: memref<128x128xbf16, #tpu.memory_space<vmem>>, %arg4: memref<128x128xf32, #tpu.memory_space<vmem>>, %arg5: memref<8x128xf32, #tpu.memory_space<vmem>>, %arg6: memref<128x128xf32, #tpu.memory_space<vmem>>) attributes {dimension_semantics = [#tpu.dimension_semantics<parallel>, #tpu.dimension_semantics<arbitrary>], iteration_bounds = array<i64: 4, 1>, scalar_prefetch = 0 : i64, scratch_operands = 1 : i64, tpu.core_type = #tpu.core_type<tc>, window_params = [{transform_indices = @transform_0, window_bounds = array<i64: 128, 128>}, {transform_indices = @transform_1, window_bounds = array<i64: 128, 128>}, {transform_indices = @transform_2, window_bounds = array<i64: 128, 128>}, {transform_indices = @transform_3, window_bounds = array<i64: 8, 128>}]} {
    %c0_i32 = arith.constant 0 : i32
    %0 = arith.cmpi eq, %arg1, %c0_i32 : i32
    %1 = arith.extui %0 : i1 to i32
    %c0_i32_0 = arith.constant 0 : i32
    %2 = arith.cmpi ne, %1, %c0_i32_0 : i32
    scf.if %2 {
      %cst_10 = arith.constant 0.000000e+00 : f32
      %12 = vector.broadcast %cst_10 : f32 to vector<128x128xf32>
      %c0_11 = arith.constant 0 : index
      %c0_12 = arith.constant 0 : index
      %13 = vector.load %arg6[%c0_11, %c0_12] : memref<128x128xf32, #tpu.memory_space<vmem>>, vector<128x128xf32>
      tpu.vector_store %arg6[%c0_11, %c0_12], %12 {strides = array<i32>} : memref<128x128xf32, #tpu.memory_space<vmem>>, vector<128x128xf32>,
    } else {
    }
    %c0 = arith.constant 0 : index
    %c0_1 = arith.constant 0 : index
    %3 = vector.load %arg6[%c0, %c0_1] : memref<128x128xf32, #tpu.memory_space<vmem>>, vector<128x128xf32>
    %c0_2 = arith.constant 0 : index
    %c0_3 = arith.constant 0 : index
    %4 = vector.load %arg2[%c0_2, %c0_3] : memref<128x128xbf16, #tpu.memory_space<vmem>>, vector<128x128xbf16>
    %c0_4 = arith.constant 0 : index
    %c0_5 = arith.constant 0 : index
    %5 = vector.load %arg3[%c0_4, %c0_5] : memref<128x128xbf16, #tpu.memory_space<vmem>>, vector<128x128xbf16>
    %cst = arith.constant dense<0.000000e+00> : vector<128x128xf32>
    %6 = tpu.matmul %4, %5, %cst {dimension_numbers = #tpu.dot_dimension_numbers<[1], [0], [0], [1], [0, 0, 1, 1], [], []>} : vector<128x128xbf16>, vector<128x128xbf16>, vector<128x128xf32> -> vector<128x128xf32>
    %7 = arith.addf %3, %6 : vector<128x128xf32>
    %c0_6 = arith.constant 0 : index
    %c0_7 = arith.constant 0 : index
    %8 = vector.load %arg6[%c0_6, %c0_7] : memref<128x128xf32, #tpu.memory_space<vmem>>, vector<128x128xf32>
    tpu.vector_store %arg6[%c0_6, %c0_7], %7 {strides = array<i32>} : memref<128x128xf32, #tpu.memory_space<vmem>>, vector<128x128xf32>,
    %c0_i32_8 = arith.constant 0 : i32
    %9 = arith.cmpi eq, %arg1, %c0_i32_8 : i32
    %10 = arith.extui %9 : i1 to i32
    %c0_i32_9 = arith.constant 0 : i32
    %11 = arith.cmpi ne, %10, %c0_i32_9 : i32
    scf.if %11 {
      %c0_10 = arith.constant 0 : index
      %c0_11 = arith.constant 0 : index
      %12 = vector.load %arg6[%c0_10, %c0_11] : memref<128x128xf32, #tpu.memory_space<vmem>>, vector<128x128xf32>
      %c0_12 = arith.constant 0 : index
      %c0_13 = arith.constant 0 : index
      %13 = vector.load %arg4[%c0_12, %c0_13] : memref<128x128xf32, #tpu.memory_space<vmem>>, vector<128x128xf32>
      tpu.vector_store %arg4[%c0_12, %c0_13], %12 {strides = array<i32>} : memref<128x128xf32, #tpu.memory_space<vmem>>, vector<128x128xf32>,
      %cst_14 = arith.constant dense<0.000000e+00> : vector<128xf32>
      %14 = vector.multi_reduction <add>, %12, %cst_14 [0] : vector<128x128xf32> to vector<128xf32>
      %15 = vector.shape_cast %14 : vector<128xf32> to vector<1x128xf32>
      %16 = arith.mulf %12, %12 : vector<128x128xf32>
      %cst_15 = arith.constant dense<0.000000e+00> : vector<128xf32>
      %17 = vector.multi_reduction <add>, %16, %cst_15 [0] : vector<128x128xf32> to vector<128xf32>
      %18 = vector.shape_cast %17 : vector<128xf32> to vector<1x128xf32>
      %19 = tpu.iota {dimensions = array<i32: 0>} : vector<8x128xi32>
      %c0_i32_16 = arith.constant 0 : i32
      %20 = vector.broadcast %c0_i32_16 : i32 to vector<8x128xi32>
      %21 = arith.cmpi eq, %19, %20 : vector<8x128xi32>
      %c1_i32 = arith.constant 1 : i32
      %22 = vector.broadcast %c1_i32 : i32 to vector<8x128xi32>
      %23 = arith.cmpi eq, %19, %22 : vector<8x128xi32>
      %cst_17 = arith.constant 0.000000e+00 : f32
      %24 = vector.shape_cast %18 : vector<1x128xf32> to vector<1x128xf32>
      %25 = vector.broadcast %24 : vector<1x128xf32> to vector<8x128xf32>
      %26 = vector.broadcast %cst_17 : f32 to vector<8x128xf32>
      %27 = arith.select %23, %25, %26 : vector<8x128xi1>, vector<8x128xf32>
      %28 = vector.shape_cast %15 : vector<1x128xf32> to vector<1x128xf32>
      %29 = vector.broadcast %28 : vector<1x128xf32> to vector<8x128xf32>
      %30 = arith.select %21, %29, %27 : vector<8x128xi1>, vector<8x128xf32>
      %c0_18 = arith.constant 0 : index
      %c0_19 = arith.constant 0 : index
      %31 = vector.load %arg5[%c0_18, %c0_19] : memref<8x128xf32, #tpu.memory_space<vmem>>, vector<8x128xf32>
      tpu.vector_store %arg5[%c0_18, %c0_19], %30 {strides = array<i32>} : memref<8x128xf32, #tpu.memory_space<vmem>>, vector<8x128xf32>,
    } else {
    }
    return
  }
  func.func @transform_0(%arg0: i32, %arg1: i32) -> (i32, i32) {
    %c0_i32 = arith.constant 0 : i32
    return %arg0, %arg1 : i32, i32
  }
  func.func @transform_1(%arg0: i32, %arg1: i32) -> (i32, i32) {
    %c0_i32 = arith.constant 0 : i32
    %c0_i32_0 = arith.constant 0 : i32
    return %arg1, %c0_i32 : i32, i32
  }
  func.func @transform_2(%arg0: i32, %arg1: i32) -> (i32, i32) {
    %c0_i32 = arith.constant 0 : i32
    %c0_i32_0 = arith.constant 0 : i32
    return %arg0, %c0_i32 : i32, i32
  }
  func.func @transform_3(%arg0: i32, %arg1: i32) -> (i32, i32) {
    %c0_i32 = arith.constant 0 : i32
    %c0_i32_0 = arith.constant 0 : i32
    return %arg0, %c0_i32 : i32, i32
  }
}

module attributes {stable_mosaic.version = 11 : i64} {
  func.func @bn_apply_kernel(%arg0: i32, %arg1: memref<128x128xf32, #tpu.memory_space<vmem>>, %arg2: memref<1x128xf32, #tpu.memory_space<vmem>>, %arg3: memref<1x128xf32, #tpu.memory_space<vmem>>, %arg4: memref<128x128xf32, #tpu.memory_space<vmem>>) attributes {dimension_semantics = [#tpu.dimension_semantics<parallel>], iteration_bounds = array<i64: 4>, scalar_prefetch = 0 : i64, scratch_operands = 0 : i64, tpu.core_type = #tpu.core_type<tc>, window_params = [{transform_indices = @transform_0, window_bounds = array<i64: 128, 128>}, {pipeline_mode = #tpu.pipeline_mode<synchronous>, transform_indices = @transform_1, window_bounds = array<i64: 1, 128>}, {pipeline_mode = #tpu.pipeline_mode<synchronous>, transform_indices = @transform_2, window_bounds = array<i64: 1, 128>}, {transform_indices = @transform_3, window_bounds = array<i64: 128, 128>}]} {
    %c0 = arith.constant 0 : index
    %c0_0 = arith.constant 0 : index
    %0 = vector.load %arg1[%c0, %c0_0] : memref<128x128xf32, #tpu.memory_space<vmem>>, vector<128x128xf32>
    %c0_1 = arith.constant 0 : index
    %c0_2 = arith.constant 0 : index
    %1 = vector.load %arg2[%c0_1, %c0_2] : memref<1x128xf32, #tpu.memory_space<vmem>>, vector<1x128xf32>
    %2 = vector.broadcast %1 : vector<1x128xf32> to vector<128x128xf32>
    %3 = arith.mulf %0, %2 : vector<128x128xf32>
    %c0_3 = arith.constant 0 : index
    %c0_4 = arith.constant 0 : index
    %4 = vector.load %arg3[%c0_3, %c0_4] : memref<1x128xf32, #tpu.memory_space<vmem>>, vector<1x128xf32>
    %5 = vector.broadcast %4 : vector<1x128xf32> to vector<128x128xf32>
    %6 = arith.addf %3, %5 : vector<128x128xf32>
    %c0_5 = arith.constant 0 : index
    %c0_6 = arith.constant 0 : index
    %7 = vector.load %arg4[%c0_5, %c0_6] : memref<128x128xf32, #tpu.memory_space<vmem>>, vector<128x128xf32>
    tpu.vector_store %arg4[%c0_5, %c0_6], %6 {strides = array<i32>} : memref<128x128xf32, #tpu.memory_space<vmem>>, vector<128x128xf32>,
    return
  }
  func.func @transform_0(%arg0: i32) -> (i32, i32) {
    %c0_i32 = arith.constant 0 : i32
    %c0_i32_0 = arith.constant 0 : i32
    return %arg0, %c0_i32 : i32, i32
  }
  func.func @transform_1(%arg0: i32) -> (i32, i32) {
    %c0_i32 = arith.constant 0 : i32
    %c0_i32_0 = arith.constant 0 : i32
    %c0_i32_1 = arith.constant 0 : i32
    return %c0_i32, %c0_i32_0 : i32, i32
  }
  func.func @transform_2(%arg0: i32) -> (i32, i32) {
    %c0_i32 = arith.constant 0 : i32
    %c0_i32_0 = arith.constant 0 : i32
    %c0_i32_1 = arith.constant 0 : i32
    return %c0_i32, %c0_i32_0 : i32, i32
  }
  func.func @transform_3(%arg0: i32) -> (i32, i32) {
    %c0_i32 = arith.constant 0 : i32
    %c0_i32_0 = arith.constant 0 : i32
    return %arg0, %c0_i32 : i32, i32
  }
}

</mosaic_0001>

<bundles_post_ra>
// kernel: conv2d_bn.3
= control target key start
LH: loop header
LB: loop body
LE: loop exit
PB: predicated region body
PF: predicated region fallthrough
CT: control target
= control target key end

     0   :  { %s351_s12 = smov 0   ;;  %s410_s0 = inlined_call_operand.vmem [shape: f32[512,128], index: 0, kind: input, shape index: {}]   ;;  %s411_s1 = inlined_call_operand.vmem [shape: f32[1,128], index: 1, kind: input, shape index: {}]   ;;  %s412_s2 = inlined_call_operand.vmem [shape: f32[1,128], index: 2, kind: input, shape index: {}]   ;;  %s413_s3 = inlined_call_operand.vmem [shape: f32[512,128], index: 3, kind: output, shape index: {}]  }
   0x1 LB: > { %s302_s13 = sadd.s32 4294967295, %s329_s12   ;;  %p306_p0 = scmp.ge.s32.totalorder %s329_s12, 1  ;;  %s329_s12 = sphi %s351_s12, %s13_s12  }
   0x2   : > { %p138_p1 = scmp.lt.s32.totalorder %s329_s12, 5 }
   0x4   : > { %p139_p2 = pnand %p306_p0, %p138_p1 }
   0x5   : > { %s307_s14 = sshll.u32 (!%p139_p2), %s302_s13, 4 }
   0x6   : > { %142 = sbr.rel (%p139_p2) target bundleno = 35 (0x23), region = 32  ;;  %p163_p3 = scmp.lt.s32.totalorder (!%p139_p2), %s307_s14, 63 }
   0xb   : > { %s415_s14 = smov (!%p163_p3, %s307_s14), 63  ;;  %v321_v0 = vld [vmem:[%s411_s1] ss:$0 sm:$0xff] }
   0xc   : > { %s308_s17 = sshll.u32 %s415_s14, 3  ;;  %v322_v1 = vld [vmem:[%s412_s2] ss:$0 sm:$0xff] }
   0xd   : > { %s365_s20 = scalar_lea.vmem %s410_s0, %s308_s17  ;;  %s379_s25 = scalar_lea.vmem %s413_s3, %s308_s17 }
   0xe   : > { %v174_v2 = vld [vmem:[%s365_s20] sm:$0xff]  ;;  %v175_v3 = vld [vmem:[%s365_s20 + $0x8] sm:$0xff]  ;;  %v176_v4 = vld [vmem:[%s365_s20 + $0x10] sm:$0xff] }
   0xf   : > { %v194_v5 = vmul.f32 %v321_v0, %v174_v2  ;;  %v195_v6 = vmul.f32 %v321_v0, %v175_v3  ;;  %v196_v7 = vmul.f32 %v321_v0, %v176_v4  ;;  %v177_v8 = vld [vmem:[%s365_s20 + $0x18] sm:$0xff]  ;;  %v178_v9 = vld [vmem:[%s365_s20 + $0x20] sm:$0xff]  ;;  %v179_v10 = vld [vmem:[%s365_s20 + $0x28] sm:$0xff] }
  0x10   : > { %v197_v11 = vmul.f32 %v321_v0, %v177_v8  ;;  %v198_v12 = vmul.f32 %v321_v0, %v178_v9  ;;  %v199_v13 = vmul.f32 %v321_v0, %v179_v10  ;;  %v180_v14 = vld [vmem:[%s365_s20 + $0x30] sm:$0xff]  ;;  %v181_v15 = vld [vmem:[%s365_s20 + $0x38] sm:$0xff]  ;;  %v182_v16 = vld [vmem:[%s365_s20 + $0x40] sm:$0xff] }
  0x11   : > { %v214_v17 = vadd.f32 %v322_v1, %v194_v5  ;;  %v215_v18 = vadd.f32 %v322_v1, %v195_v6  ;;  %v216_v19 = vadd.f32 %v322_v1, %v196_v7  ;;  %v200_v20 = vmul.f32 %v321_v0, %v180_v14  ;;  %v183_v21 = vld [vmem:[%s365_s20 + $0x48] sm:$0xff]  ;;  %v184_v24 = vld [vmem:[%s365_s20 + $0x50] sm:$0xff]  ;;  %v185_v27 = vld [vmem:[%s365_s20 + $0x58] sm:$0xff] }
  0x12   : > { %v217_v22 = vadd.f32 %v322_v1, %v197_v11  ;;  %v201_v23 = vmul.f32 %v321_v0, %v181_v15  ;;  %v218_v25 = vadd.f32 %v322_v1, %v198_v12  ;;  %v202_v26 = vmul.f32 %v321_v0, %v182_v16  ;;  %v186_v30 = vld [vmem:[%s365_s20 + $0x60] sm:$0xff]  ;;  %v187_v33 = vld [vmem:[%s365_s20 + $0x68] sm:$0xff]  ;;  %v188_v36 = vld [vmem:[%s365_s20 + $0x70] sm:$0xff] }
  0x13   : > { %230 = vst [vmem:[%s379_s25] sm:$0xff] %v214_v17  ;;  %v219_v28 = vadd.f32 %v322_v1, %v199_v13  ;;  %v203_v29 = vmul.f32 %v321_v0, %v183_v21  ;;  %v220_v31 = vadd.f32 %v322_v1, %v200_v20  ;;  %v204_v32 = vmul.f32 %v321_v0, %v184_v24  ;;  %v189_v39 = vld [vmem:[%s365_s20 + $0x78] sm:$0xff] }
  0x14   : > { %231 = vst [vmem:[%s379_s25 + $0x8] sm:$0xff] %v215_v18  ;;  %v221_v34 = vadd.f32 %v322_v1, %v201_v23  ;;  %v205_v35 = vmul.f32 %v321_v0, %v185_v27  ;;  %v222_v37 = vadd.f32 %v322_v1, %v202_v26  ;;  %v206_v38 = vmul.f32 %v321_v0, %v186_v30 }
  0x15   : > { %232 = vst [vmem:[%s379_s25 + $0x10] sm:$0xff] %v216_v19  ;;  %v223_v40 = vadd.f32 %v322_v1, %v203_v29  ;;  %v207_v41 = vmul.f32 %v321_v0, %v187_v33  ;;  %v224_v42 = vadd.f32 %v322_v1, %v204_v32  ;;  %v208_v43 = vmul.f32 %v321_v0, %v188_v36 }
  0x16   : > { %233 = vst [vmem:[%s379_s25 + $0x18] sm:$0xff] %v217_v22  ;;  %v225_v44 = vadd.f32 %v322_v1, %v205_v35  ;;  %v209_v45 = vmul.f32 %v321_v0, %v189_v39  ;;  %v226_v46 = vadd.f32 %v322_v1, %v206_v38 }
  0x17   : > { %234 = vst [vmem:[%s379_s25 + $0x20] sm:$0xff] %v218_v25  ;;  %v227_v47 = vadd.f32 %v322_v1, %v207_v41  ;;  %v228_v48 = vadd.f32 %v322_v1, %v208_v43 }
  0x18   : > { %235 = vst [vmem:[%s379_s25 + $0x28] sm:$0xff] %v219_v28  ;;  %v229_v49 = vadd.f32 %v322_v1, %v209_v45 }
  0x19   : > { %236 = vst [vmem:[%s379_s25 + $0x30] sm:$0xff] %v220_v31 }
  0x1a   : > { %237 = vst [vmem:[%s379_s25 + $0x38] sm:$0xff] %v221_v34 }
  0x1b   : > { %238 = vst [vmem:[%s379_s25 + $0x40] sm:$0xff] %v222_v37 }
  0x1c   : > { %239 = vst [vmem:[%s379_s25 + $0x48] sm:$0xff] %v223_v40 }
  0x1d   : > { %240 = vst [vmem:[%s379_s25 + $0x50] sm:$0xff] %v224_v42 }
  0x1e   : > { %241 = vst [vmem:[%s379_s25 + $0x58] sm:$0xff] %v225_v44 }
  0x1f   : > { %242 = vst [vmem:[%s379_s25 + $0x60] sm:$0xff] %v226_v46 }
  0x20   : > { %243 = vst [vmem:[%s379_s25 + $0x68] sm:$0xff] %v227_v47 }
  0x21   : > { %244 = vst [vmem:[%s379_s25 + $0x70] sm:$0xff] %v228_v48 }
  0x22   : > { %245 = vst [vmem:[%s379_s25 + $0x78] sm:$0xff] %v229_v49 }
  0x23 PF: > { %s13_s12 = sadd.s32 1, %s329_s12  }
  0x24   : > { %p10_p4 = scmp.ge.s32.totalorder %s13_s12, 6  }
  0x26   :  { %12 = sbr.rel (!%p10_p4) target bundleno = 1 (0x1), region = 62 }

// kernel: conv2d_bn.2
= control target key start
LH: loop header
LB: loop body
LE: loop exit
PB: predicated region body
PF: predicated region fallthrough
CT: control target
= control target key end

     0   :  { %s874_s12 = smov 0   ;;  %s876_s13 = smov 0   ;;  %s961_s0 = inlined_call_operand.vmem [shape: bf16[512,128], index: 0, kind: input, shape index: {}]   ;;  %s962_s1 = inlined_call_operand.vmem [shape: bf16[128,128], index: 1, kind: input, shape index: {}]   ;;  %s963_s2 = inlined_call_operand.vmem [shape: f32[512,128], index: 2, kind: output, shape index: {0}]   ;;  %s964_s3 = inlined_call_operand.vmem [shape: f32[32,128], index: 3, kind: output, shape index: {1}]  }
   0x1   :  { %s878_s14 = smov 0  }
   0x2 LB: > { %s26_s15 = sadd.s32 1, %s848_s13  ;;  %p694_p0 = scmp.ge.s32.totalorder %s852_s14, 1  ;;  %s852_s14 = sphi %s878_s14, %s14_s14   ;;  %s848_s13 = sphi %s876_s13, %s966_s13   ;;  %s844_s12 = sphi %s874_s12, %s965_s12  }
   0x3   : > { %p28_p1 = scmp.ge.s32.totalorder %s26_s15, 4  ;;  %p169_p2 = scmp.lt.s32.totalorder %s852_s14, 5 }
   0x5   : > { %s968_s15 = smov (%p28_p1, %s26_s15), 0  ;;  %p170_p3 = pnand %p694_p0, %p169_p2 }
   0x6   : > { %s695_s24 = sshll.u32 (!%p170_p3), %s844_s12, 4  ;;  %p226_p5 = scmp.lt.s32.totalorder (!%p170_p3), %s844_s12, 3 }
   0x7   : > { %173 = sbr.rel (%p170_p3) target bundleno = 237 (0xed), region = 28  ;;  %p206_p4 = scmp.lt.s32.totalorder (!%p170_p3), %s695_s24, 63 }
   0xc   : > { %v781_v0 = vld [vmem:[%s962_s1 + $0x38] sm:$0xff]  ;;  %v780_v1 = vld [vmem:[%s962_s1 + $0x30] sm:$0xff]  ;;  %v779_v2 = vld [vmem:[%s962_s1 + $0x28] sm:$0xff]  ;;  %s970_s24 = smov (!%p206_p4, %s695_s24), 63  ;;  %s972_s12 = smov (!%p226_p5, %s844_s12), 3 }
   0xd   : > { %394 = vmatpush.bf16.msra.mxu0 %v781_v0  ;;  %782 = vmatpush.bf16.msra.mxu1 %v781_v0  ;;  %v778_v3 = vld [vmem:[%s962_s1 + $0x20] sm:$0xff]  ;;  %v777_v4 = vld [vmem:[%s962_s1 + $0x18] sm:$0xff]  ;;  %v776_v5 = vld [vmem:[%s962_s1 + $0x10] sm:$0xff]  ;;  %s696_s4 = sshll.u32 %s970_s24, 2  ;;  %s698_s10 = sshll.u32 %s970_s24, 3 }
   0xe   : > { %783 = vmatpush.bf16.msra.mxu2 %v781_v0  ;;  %784 = vmatpush.bf16.msra.mxu3 %v781_v0  ;;  %v775_v6 = vld [vmem:[%s962_s1 + $0x8] sm:$0xff]  ;;  %v774_v7 = vld [vmem:[%s962_s1] sm:$0xff]  ;;  %s212_s9 = scalar_lea.vmem %s961_s0, %s696_s4  ;;  %s929_s17 = scalar_lea.vmem %s963_s2, %s698_s10 }
   0xf   : > { %v766_v8 = vld [vmem:[%s212_s9] sm:$0xff]  ;;  %v768_v9 = vld [vmem:[%s212_s9 + $0x10] sm:$0xff]  ;;  %v767_v12 = vld [vmem:[%s212_s9 + $0x8] sm:$0xff]  ;;  %s699_s18 = sshll.u32 %s972_s12, 3 }
  0x10   : > { %v770_v10 = vld [vmem:[%s212_s9 + $0x20] sm:$0xff]  ;;  %v772_v11 = vld [vmem:[%s212_s9 + $0x30] sm:$0xff]  ;;  %v769_v13 = vld [vmem:[%s212_s9 + $0x18] sm:$0xff]  ;;  %s229_s21 = scalar_lea.vmem %s964_s3, %s699_s18 }
  0x11   : > { %395 = vmatpush.bf16.msra.mxu0 %v780_v1  ;;  %785 = vmatpush.bf16.msra.mxu1 %v780_v1  ;;  %v771_v14 = vld [vmem:[%s212_s9 + $0x28] sm:$0xff]  ;;  %v773_v15 = vld [vmem:[%s212_s9 + $0x38] sm:$0xff] }
  0x12   : > { %786 = vmatpush.bf16.msra.mxu2 %v780_v1  ;;  %787 = vmatpush.bf16.msra.mxu3 %v780_v1 }
  0x15   : > { %396 = vmatpush.bf16.msra.mxu0 %v779_v2  ;;  %788 = vmatpush.bf16.msra.mxu1 %v779_v2 }
  0x16   : > { %789 = vmatpush.bf16.msra.mxu2 %v779_v2  ;;  %790 = vmatpush.bf16.msra.mxu3 %v779_v2 }
  0x19   : > { %397 = vmatpush.bf16.msra.mxu0 %v778_v3  ;;  %791 = vmatpush.bf16.msra.mxu1 %v778_v3 }
  0x1a   : > { %792 = vmatpush.bf16.msra.mxu2 %v778_v3  ;;  %793 = vmatpush.bf16.msra.mxu3 %v778_v3 }
  0x1d   : > { %398 = vmatpush.bf16.msra.mxu0 %v777_v4  ;;  %794 = vmatpush.bf16.msra.mxu1 %v777_v4 }
  0x1e   : > { %795 = vmatpush.bf16.msra.mxu2 %v777_v4  ;;  %796 = vmatpush.bf16.msra.mxu3 %v777_v4 }
  0x21   : > { %399 = vmatpush.bf16.msra.mxu0 %v776_v5  ;;  %797 = vmatpush.bf16.msra.mxu1 %v776_v5 }
  0x22   : > { %798 = vmatpush.bf16.msra.mxu2 %v776_v5  ;;  %799 = vmatpush.bf16.msra.mxu3 %v776_v5 }
  0x25   : > { %400 = vmatpush.bf16.msra.mxu0 %v775_v6  ;;  %800 = vmatpush.bf16.msra.mxu1 %v775_v6 }
  0x26   : > { %801 = vmatpush.bf16.msra.mxu2 %v775_v6  ;;  %802 = vmatpush.bf16.msra.mxu3 %v775_v6 }
  0x29   : > { %401 = vmatpush.bf16.msra.mxu0 %v774_v7  ;;  %803 = vmatpush.bf16.msra.mxu1 %v774_v7 }
  0x2a   : > { %804 = vmatpush.bf16.msra.mxu2 %v774_v7  ;;  %805 = vmatpush.bf16.msra.mxu3 %v774_v7 }
  0x2c   : > { %402 = vmatmul.bf16.vlgmr.msra.gmra.mxu0 %v766_v8  ;;  %412 = vmatmul.bf16.vlgmr.msra.gmra.mxu1 %v768_v9 }
  0x2d   : > { %422 = vmatmul.bf16.vlgmr.msra.gmra.mxu2 %v770_v10  ;;  %432 = vmatmul.bf16.vlgmr.msra.gmra.mxu3 %v772_v11 }
  0x3c   : > { %407 = vmatmul.bf16.gmra.mxu0 %v767_v12  ;;  %417 = vmatmul.bf16.gmra.mxu1 %v769_v13 }
  0x3d   : > { %427 = vmatmul.bf16.gmra.mxu2 %v771_v14  ;;  %437 = vmatmul.bf16.gmra.mxu3 %v773_v15 }
  0xa9   : > { %v403_v16 = vpop.f32.mrf.mxu0  ;;  %v413_v17 = vpop.f32.mrf.mxu1 }
  0xaa   : > { %494 = vst [vmem:[%s929_s17] sm:$0xff] %v403_v16  ;;  %v531_v27 = vmul.f32 %v403_v16, %v403_v16  ;;  %v535_v39 = vmul.f32 %v413_v17, %v413_v17 }
  0xab   : > { %498 = vst [vmem:[%s929_s17 + $0x20] sm:$0xff] %v413_v17 }
  0xb0   : > { %v423_v18 = vpop.f32.mrf.mxu2  ;;  %v433_v19 = vpop.f32.mrf.mxu3 }
  0xb1   : > { %v405_v20 = vpop.f32.mrf.mxu0  ;;  %v415_v21 = vpop.f32.mrf.mxu1  ;;  %502 = vst [vmem:[%s929_s17 + $0x40] sm:$0xff] %v423_v18  ;;  %v539_v53 = vmul.f32 %v423_v18, %v423_v18  ;;  %v543_v1 = vmul.f32 %v433_v19, %v433_v19 }
  0xb2   : > { %495 = vst [vmem:[%s929_s17 + $0x8] sm:$0xff] %v405_v20  ;;  %v532_v26 = vmul.f32 %v405_v20, %v405_v20  ;;  %v510_v28 = vadd.f32 %v405_v20, %v403_v16  ;;  %v536_v42 = vmul.f32 %v415_v21, %v415_v21 }
  0xb3   : > { %499 = vst [vmem:[%s929_s17 + $0x28] sm:$0xff] %v415_v21 }
  0xb4   : > { %506 = vst [vmem:[%s929_s17 + $0x60] sm:$0xff] %v433_v19  ;;  %v547_v30 = vadd.f32 %v532_v26, %v531_v27 }
  0xb8   : > { %v425_v22 = vpop.f32.mrf.mxu2  ;;  %v435_v23 = vpop.f32.mrf.mxu3 }
  0xb9   : > { %v408_v24 = vpop.f32.mrf.mxu0  ;;  %v418_v25 = vpop.f32.mrf.mxu1  ;;  %503 = vst [vmem:[%s929_s17 + $0x48] sm:$0xff] %v425_v22  ;;  %v540_v56 = vmul.f32 %v425_v22, %v425_v22  ;;  %v544_v4 = vmul.f32 %v435_v23, %v435_v23 }
  0xba   : > { %496 = vst [vmem:[%s929_s17 + $0x10] sm:$0xff] %v408_v24  ;;  %v533_v29 = vmul.f32 %v408_v24, %v408_v24  ;;  %v511_v31 = vadd.f32 %v510_v28, %v408_v24  ;;  %v537_v45 = vmul.f32 %v418_v25, %v418_v25 }
  0xbb   : > { %500 = vst [vmem:[%s929_s17 + $0x30] sm:$0xff] %v418_v25 }
  0xbc   : > { %507 = vst [vmem:[%s929_s17 + $0x68] sm:$0xff] %v435_v23  ;;  %v548_v36 = vadd.f32 %v547_v30, %v533_v29 }
  0xc0   : > { %v428_v32 = vpop.f32.mrf.mxu2  ;;  %v438_v33 = vpop.f32.mrf.mxu3 }
  0xc1   : > { %v410_v34 = vpop.f32.mrf.mxu0  ;;  %v420_v35 = vpop.f32.mrf.mxu1  ;;  %504 = vst [vmem:[%s929_s17 + $0x50] sm:$0xff] %v428_v32  ;;  %v541_v60 = vmul.f32 %v428_v32, %v428_v32  ;;  %v545_v8 = vmul.f32 %v438_v33, %v438_v33 }
  0xc2   : > { %497 = vst [vmem:[%s929_s17 + $0x18] sm:$0xff] %v410_v34  ;;  %v512_v37 = vadd.f32 %v511_v31, %v410_v34  ;;  %v534_v38 = vmul.f32 %v410_v34, %v410_v34  ;;  %v538_v51 = vmul.f32 %v420_v35, %v420_v35 }
  0xc3   : > { %501 = vst [vmem:[%s929_s17 + $0x38] sm:$0xff] %v420_v35 }
  0xc4   : > { %v513_v40 = vadd.f32 %v512_v37, %v413_v17  ;;  %v549_v41 = vadd.f32 %v548_v36, %v534_v38  ;;  %508 = vst [vmem:[%s929_s17 + $0x70] sm:$0xff] %v438_v33  ;;  %v568_v17 = vlaneseq }
  0xc6   : > { %v550_v43 = vadd.f32 %v549_v41, %v535_v39  ;;  %v514_v44 = vadd.f32 %v513_v40, %v415_v21 }
  0xc8   : > { %v515_v46 = vadd.f32 %v514_v44, %v418_v25  ;;  %v551_v47 = vadd.f32 %v550_v43, %v536_v42  ;;  %v430_v48 = vpop.f32.mrf.mxu2  ;;  %v440_v49 = vpop.f32.mrf.mxu3 }
  0xc9   : > { %505 = vst [vmem:[%s929_s17 + $0x58] sm:$0xff] %v430_v48  ;;  %v542_v0 = vmul.f32 %v430_v48, %v430_v48  ;;  %v546_v12 = vmul.f32 %v440_v49, %v440_v49 }
  0xca   : > { %v516_v50 = vadd.f32 %v515_v46, %v420_v35  ;;  %v552_v52 = vadd.f32 %v551_v47, %v537_v45  ;;  %509 = vst [vmem:[%s929_s17 + $0x78] sm:$0xff] %v440_v49 }
  0xcc   : > { %v517_v54 = vadd.f32 %v516_v50, %v423_v18  ;;  %v553_v55 = vadd.f32 %v552_v52, %v538_v51 }
  0xce   : > { %v554_v57 = vadd.f32 %v553_v55, %v539_v53  ;;  %v518_v58 = vadd.f32 %v517_v54, %v425_v22  ;;  %v569_v22 = vshrl.u32 %v568_v17, 7 }
  0xd0   : > { %v519_v59 = vadd.f32 %v518_v58, %v428_v32  ;;  %v555_v61 = vadd.f32 %v554_v57, %v540_v56  ;;  %vm571_vm0 = vcmp.eq.s32.totalorder %v569_v22, 1  ;;  %vm570_vm1 = vcmp.eq.s32.totalorder %v569_v22, 0 }
  0xd2   : > { %v556_v62 = vadd.f32 %v555_v61, %v541_v60  ;;  %v520_v63 = vadd.f32 %v519_v59, %v430_v48 }
  0xd4   : > { %v521_v2 = vadd.f32 %v520_v63, %v433_v19  ;;  %v557_v3 = vadd.f32 %v556_v62, %v542_v0 }
  0xd6   : > { %v558_v5 = vadd.f32 %v557_v3, %v543_v1  ;;  %v522_v6 = vadd.f32 %v521_v2, %v435_v23 }
  0xd8   : > { %v523_v7 = vadd.f32 %v522_v6, %v438_v33  ;;  %v559_v9 = vadd.f32 %v558_v5, %v544_v4 }
  0xda   : > { %v560_v10 = vadd.f32 %v559_v9, %v545_v8  ;;  %v524_v11 = vadd.f32 %v523_v7, %v440_v49 }
  0xdc   : > { %v525_v13 = vrot.slane %v524_v11, 4  ;;  %v561_v14 = vadd.f32 %v560_v10, %v546_v12 }
  0xde   : > { %v526_v15 = vadd.f32 %v525_v13, %v524_v11  ;;  %v562_v16 = vrot.slane %v561_v14, 4 }
  0xe0   : > { %v527_v18 = vrot.slane %v526_v15, 2  ;;  %v563_v20 = vadd.f32 %v562_v16, %v561_v14 }
  0xe2   : > { %v528_v19 = vadd.f32 %v527_v18, %v526_v15  ;;  %v564_v21 = vrot.slane %v563_v20, 2 }
  0xe4   : > { %v565_v24 = vadd.f32 %v564_v21, %v563_v20  ;;  %v529_v23 = vrot.slane %v528_v19, 1 }
  0xe6   : > { %v566_v25 = vrot.slane %v565_v24, 1  ;;  %v530_v27 = vadd.f32 %v529_v23, %v528_v19 }
  0xe8   : > { %v567_v26 = vadd.f32 %v566_v25, %v565_v24 }
  0xea   : > { %v572_v28 = vsel %vm571_vm0, %v567_v26, 0.0 }
  0xeb   : > { %v573_v29 = vsel %vm570_vm1, %v530_v27, %v572_v28 }
  0xec   : > { %574 = vst [vmem:[%s229_s21] sm:$0xff] %v573_v29 }
  0xed PF: > { %s14_s14 = sadd.s32 1, %s852_s14   ;;  %s965_s12 = smov %s848_s13 }
  0xee   : > { %p11_p6 = scmp.ge.s32.totalorder %s14_s14, 6   ;;  %s966_s13 = smov %s968_s15 }
  0xf0   :  { %13 = sbr.rel (!%p11_p6) target bundleno = 2 (0x2), region = 81 }

</bundles_post_ra>
